<compile_context>
chip_gen: v6e
topology: v6e:2x2x1
jax: 0.10.0
libtpu: 0.0.40
codegen_flags: <defaults>
</compile_context>

<pallas_src>
import math
import jax
import jax.numpy as jnp
from jax.experimental import pallas as pl
from jax.experimental.pallas import tpu as pltpu

LANE = 128


def _round_up(x, m):
    return ((x + m - 1) // m) * m


# ----------------------------- fused Pallas kernel -----------------------------

def _gcnii_fused_kernel(x_ref, a_ref, w_in_ref, b_in_ref, w1_ref, w2_ref,
                        w_out_ref, b_out_ref, o_ref, h_sc, h0_sc):
    l = pl.program_id(0)

    # --- input linear + ReLU (only once, at the first layer step) ---
    @pl.when(l == 0)
    def _():
        h = jnp.dot(x_ref[...], w_in_ref[...], preferred_element_type=jnp.float32)
        h = jnp.maximum(h + b_in_ref[...], 0.0)
        h_sc[...] = h
        h0_sc[...] = h

    # --- GCNII layer l:  h = relu( A @ (h @ W1'[l]) + h0 @ W2'[l] ) ---
    # (alpha/beta mixing is pre-folded into W1'/W2' outside the kernel)
    h_bf = h_sc[...].astype(jnp.bfloat16)
    support = jnp.dot(h_bf, w1_ref[0], preferred_element_type=jnp.float32)
    initial = jnp.dot(h0_sc[...].astype(jnp.bfloat16), w2_ref[0],
                      preferred_element_type=jnp.float32)
    agg = jnp.dot(a_ref[...], support.astype(jnp.bfloat16),
                  preferred_element_type=jnp.float32)
    h_sc[...] = jnp.maximum(agg + initial, 0.0)

    # --- output linear (only once, at the last layer step) ---
    @pl.when(l == pl.num_programs(0) - 1)
    def _():
        logits = jnp.dot(h_sc[...].astype(jnp.bfloat16), w_out_ref[...],
                         preferred_element_type=jnp.float32)
        o_ref[...] = logits + b_out_ref[...]


# ----------------------------- glue (plain JAX) -----------------------------

def gcn_norm_dense(edge_index, num_nodes):
    """Dense equivalent of PyG gcn_norm + add-aggregation:
    M[c, r] = dinv[c] * w(r->c) * dinv[r], self loops = 1.0; propagate == M @ x."""
    row, col = edge_index[0], edge_index[1]
    a = jnp.zeros((num_nodes, num_nodes), jnp.float32).at[col, row].add(1.0)
    a = a + jnp.eye(num_nodes, dtype=jnp.float32)       # add_remaining_self_loops
    deg = a.sum(axis=1)
    dinv = jnp.where(deg > 0.0, 1.0 / jnp.sqrt(deg), 0.0)
    return dinv[:, None] * a * dinv[None, :]


def glorot(key, shape):
    fan_in, fan_out = shape[0], shape[1]
    std = math.sqrt(6.0 / (fan_in + fan_out))
    return jax.random.uniform(key, shape, jnp.float32, -std, std)


class GCNIIParams:
    def __init__(self, key, num_node_features, num_classes, hid_num, num_layers):
        keys = jax.random.split(key, 4 + 2 * num_layers)
        self.w_in = glorot(keys[0], (num_node_features, hid_num))
        self.b_in = jnp.zeros((hid_num,), jnp.float32)
        self.w_out = glorot(keys[1], (hid_num, num_classes))
        self.b_out = jnp.zeros((num_classes,), jnp.float32)
        self.w1 = [glorot(keys[2 + 2 * i], (hid_num, hid_num)) for i in range(num_layers)]
        self.w2 = [glorot(keys[3 + 2 * i], (hid_num, hid_num)) for i in range(num_layers)]
        self.num_layers = num_layers


def _nbytes(shape, dtype):
    size = 1
    for s in shape:
        size *= int(s)
    return size * jnp.dtype(dtype).itemsize


def gcnii_forward(params, x, edge_index, *, alpha, lamda):
    n, f_in = x.shape
    hid = params.w_in.shape[1]
    n_cls = params.w_out.shape[1]
    num_layers = params.num_layers
    assert num_layers >= 1

    f_pad = _round_up(f_in, LANE)
    h_pad = _round_up(hid, LANE)
    c_pad = _round_up(n_cls, LANE)

    # dense normalized adjacency (cached=True in the reference -> computed once)
    a_norm = gcn_norm_dense(edge_index, n).astype(jnp.bfloat16)

    # TODO(synk): F.dropout skipped (inference / training=False -> identity).

    # pad + cast to bf16 for lane-dense MXU matmuls (zero padding preserves results)
    x_p = jnp.pad(x, ((0, 0), (0, f_pad - f_in))).astype(jnp.bfloat16)
    w_in = jnp.pad(params.w_in, ((0, f_pad - f_in), (0, h_pad - hid))).astype(jnp.bfloat16)
    b_in = jnp.pad(params.b_in, (0, h_pad - hid)).reshape(1, h_pad).astype(jnp.float32)
    w_out = jnp.pad(params.w_out, ((0, h_pad - hid), (0, c_pad - n_cls))).astype(jnp.bfloat16)
    b_out = jnp.pad(params.b_out, (0, c_pad - n_cls)).reshape(1, c_pad).astype(jnp.float32)

    # fold the GCNII scalar mixing into the per-layer weights (O(H^2) prep)
    eye = jnp.eye(h_pad, dtype=jnp.float32)
    w1_stack, w2_stack = [], []
    for i in range(num_layers):
        beta = math.log(lamda / (i + 1) + 1.0)
        w1_p = jnp.pad(params.w1[i], ((0, h_pad - hid), (0, h_pad - hid)))
        w2_p = jnp.pad(params.w2[i], ((0, h_pad - hid), (0, h_pad - hid)))
        w1_stack.append((1.0 - beta) * (1.0 - alpha) * eye + beta * w1_p)
        w2_stack.append((1.0 - beta) * alpha * eye + beta * w2_p)
    w1_stack = jnp.stack(w1_stack).astype(jnp.bfloat16)   # [L, Hp, Hp]
    w2_stack = jnp.stack(w2_stack).astype(jnp.bfloat16)   # [L, Hp, Hp]

    def fixed2(l):
        return (0, 0)

    def per_layer3(l):
        return (l, 0, 0)

    # explicit scoped-VMEM budget: resident blocks (x2 for double buffering) + scratch + headroom
    resident = (
        _nbytes((n, f_pad), jnp.bfloat16) + _nbytes((n, n), jnp.bfloat16)
        + _nbytes((f_pad, h_pad), jnp.bfloat16) + _nbytes((1, h_pad), jnp.float32)
        + 2 * _nbytes((h_pad, h_pad), jnp.bfloat16)            # W1', W2' (per layer)
        + _nbytes((h_pad, c_pad), jnp.bfloat16) + _nbytes((1, c_pad), jnp.float32)
        + _nbytes((n, c_pad), jnp.float32)
        + 2 * _nbytes((n, h_pad), jnp.float32)                 # h / h0 scratch
    )
    vmem_limit = int(min(max(2 * resident + (4 << 20), 16 << 20), 48 << 20))

    # TODO(synk): for large N, tile the A@support matmul (row/k grid, f32
    # accumulator, block-CSR skip of empty adjacency tiles) instead of keeping
    # the whole [N, N] adjacency resident in one VMEM block.
    out_padded = pl.pallas_call(
        _gcnii_fused_kernel,
        out_shape=jax.ShapeDtypeStruct((n, c_pad), jnp.float32),
        grid_spec=pltpu.PrefetchScalarGridSpec(
            num_scalar_prefetch=0,
            grid=(num_layers,),
            in_specs=[
                pl.BlockSpec((n, f_pad), fixed2),             # x (padded, bf16)
                pl.BlockSpec((n, n), fixed2),                 # A_norm (bf16)
                pl.BlockSpec((f_pad, h_pad), fixed2),         # W_in
                pl.BlockSpec((1, h_pad), fixed2),             # b_in
                pl.BlockSpec((1, h_pad, h_pad), per_layer3),  # W1'[l]
                pl.BlockSpec((1, h_pad, h_pad), per_layer3),  # W2'[l]
                pl.BlockSpec((h_pad, c_pad), fixed2),         # W_out
                pl.BlockSpec((1, c_pad), fixed2),             # b_out
            ],
            out_specs=pl.BlockSpec((n, c_pad), fixed2),
            scratch_shapes=[
                pltpu.VMEM((n, h_pad), jnp.float32),   # h  (resident across layers)
                pltpu.VMEM((n, h_pad), jnp.float32),   # h0 (resident across layers)
            ],
        ),
        compiler_params=pltpu.CompilerParams(
            dimension_semantics=("arbitrary",),
            vmem_limit_bytes=vmem_limit,
        ),
    )(x_p, a_norm, w_in, b_in, w1_stack, w2_stack, w_out, b_out)

    return out_padded[:, :n_cls]


# ----------------------------- main -----------------------------

if __name__ == "__main__":
    N = 64            # nodes
    F_IN = 16         # num_node_features
    HID = 32          # hid_num
    NUM_CLASSES = 8
    NUM_LAYERS = 2    # args.layer
    ALPHA = 0.1       # args.alpha
    LAMDA = 0.5       # args.lamda
    E = 256           # directed edges before symmetrization

    key = jax.random.PRNGKey(0)
    kx, ks, kd, kp = jax.random.split(key, 4)

    x = jax.random.normal(kx, (N, F_IN), jnp.float32)

    src = jax.random.randint(ks, (E,), 0, N)
    dst = jax.random.randint(kd, (E,), 0, N)
    # avoid pre-existing self loops (gcn_norm adds them with fill_value=1.0)
    dst = jnp.where(src == dst, (dst + 1) % N, dst)
    # symmetric edge_index, shape [2, 2E]
    edge_index = jnp.stack([jnp.concatenate([src, dst]),
                            jnp.concatenate([dst, src])], axis=0)

    params = GCNIIParams(kp, F_IN, NUM_CLASSES, HID, NUM_LAYERS)

    out = gcnii_forward(params, x, edge_index, alpha=ALPHA, lamda=LAMDA)
    out = jax.block_until_ready(out)
    assert out.shape == (N, NUM_CLASSES)
    print("KERNEL_OK")
</pallas_src>

<mosaic_0001>
module attributes {stable_mosaic.version = 11 : i64} {
  func.func @_gcnii_fused_kernel(%arg0: i32, %arg1: memref<64x128xbf16, #tpu.memory_space<vmem>>, %arg2: memref<64x64xbf16, #tpu.memory_space<vmem>>, %arg3: memref<128x128xbf16, #tpu.memory_space<vmem>>, %arg4: memref<1x128xf32, #tpu.memory_space<vmem>>, %arg5: memref<1x128x128xbf16, #tpu.memory_space<vmem>>, %arg6: memref<1x128x128xbf16, #tpu.memory_space<vmem>>, %arg7: memref<128x128xbf16, #tpu.memory_space<vmem>>, %arg8: memref<1x128xf32, #tpu.memory_space<vmem>>, %arg9: memref<64x128xf32, #tpu.memory_space<vmem>>, %arg10: memref<64x128xf32, #tpu.memory_space<vmem>>, %arg11: memref<64x128xf32, #tpu.memory_space<vmem>>) attributes {dimension_semantics = [#tpu.dimension_semantics<arbitrary>], iteration_bounds = array<i64: 2>, scalar_prefetch = 0 : i64, scratch_operands = 2 : i64, tpu.core_type = #tpu.core_type<tc>, window_params = [{pipeline_mode = #tpu.pipeline_mode<synchronous>, transform_indices = @transform_0, window_bounds = array<i64: 64, 128>}, {pipeline_mode = #tpu.pipeline_mode<synchronous>, transform_indices = @transform_1, window_bounds = array<i64: 64, 64>}, {pipeline_mode = #tpu.pipeline_mode<synchronous>, transform_indices = @transform_2, window_bounds = array<i64: 128, 128>}, {pipeline_mode = #tpu.pipeline_mode<synchronous>, transform_indices = @transform_3, window_bounds = array<i64: 1, 128>}, {transform_indices = @transform_4, window_bounds = array<i64: 1, 128, 128>}, {transform_indices = @transform_5, window_bounds = array<i64: 1, 128, 128>}, {pipeline_mode = #tpu.pipeline_mode<synchronous>, transform_indices = @transform_6, window_bounds = array<i64: 128, 128>}, {pipeline_mode = #tpu.pipeline_mode<synchronous>, transform_indices = @transform_7, window_bounds = array<i64: 1, 128>}, {pipeline_mode = #tpu.pipeline_mode<synchronous>, transform_indices = @transform_8, window_bounds = array<i64: 64, 128>}]} {
    %c0_i32 = arith.constant 0 : i32
    %0 = arith.cmpi eq, %arg0, %c0_i32 : i32
    %1 = arith.extui %0 : i1 to i32
    %c0_i32_0 = arith.constant 0 : i32
    %2 = arith.cmpi ne, %1, %c0_i32_0 : i32
    scf.if %2 {
      %c0_18 = arith.constant 0 : index
      %c0_19 = arith.constant 0 : index
      %23 = vector.load %arg1[%c0_18, %c0_19] : memref<64x128xbf16, #tpu.memory_space<vmem>>, vector<64x128xbf16>
      %c0_20 = arith.constant 0 : index
      %c0_21 = arith.constant 0 : index
      %24 = vector.load %arg3[%c0_20, %c0_21] : memref<128x128xbf16, #tpu.memory_space<vmem>>, vector<128x128xbf16>
      %cst_22 = arith.constant dense<0.000000e+00> : vector<64x128xf32>
      %25 = tpu.matmul %23, %24, %cst_22 {dimension_numbers = #tpu.dot_dimension_numbers<[1], [0], [0], [1], [0, 0, 1, 1], [], []>} : vector<64x128xbf16>, vector<128x128xbf16>, vector<64x128xf32> -> vector<64x128xf32>
      %c0_23 = arith.constant 0 : index
      %c0_24 = arith.constant 0 : index
      %26 = vector.load %arg4[%c0_23, %c0_24] : memref<1x128xf32, #tpu.memory_space<vmem>>, vector<1x128xf32>
      %27 = vector.broadcast %26 : vector<1x128xf32> to vector<64x128xf32>
      %28 = arith.addf %25, %27 : vector<64x128xf32>
      %cst_25 = arith.constant 0.000000e+00 : f32
      %29 = vector.broadcast %cst_25 : f32 to vector<64x128xf32>
      %30 = arith.maximumf %28, %29 : vector<64x128xf32>
      %c0_26 = arith.constant 0 : index
      %c0_27 = arith.constant 0 : index
      %31 = vector.load %arg10[%c0_26, %c0_27] : memref<64x128xf32, #tpu.memory_space<vmem>>, vector<64x128xf32>
      tpu.vector_store %arg10[%c0_26, %c0_27], %30 {strides = array<i32>} : memref<64x128xf32, #tpu.memory_space<vmem>>, vector<64x128xf32>,
      %c0_28 = arith.constant 0 : index
      %c0_29 = arith.constant 0 : index
      %32 = vector.load %arg11[%c0_28, %c0_29] : memref<64x128xf32, #tpu.memory_space<vmem>>, vector<64x128xf32>
      tpu.vector_store %arg11[%c0_28, %c0_29], %30 {strides = array<i32>} : memref<64x128xf32, #tpu.memory_space<vmem>>, vector<64x128xf32>,
    } else {
    }
    %c0 = arith.constant 0 : index
    %c0_1 = arith.constant 0 : index
    %3 = vector.load %arg10[%c0, %c0_1] : memref<64x128xf32, #tpu.memory_space<vmem>>, vector<64x128xf32>
    %4 = arith.truncf %3 : vector<64x128xf32> to vector<64x128xbf16>
    %c0_2 = arith.constant 0 : index
    %c0_3 = arith.constant 0 : index
    %c0_4 = arith.constant 0 : index
    %5 = vector.load %arg5[%c0_2, %c0_3, %c0_4] : memref<1x128x128xbf16, #tpu.memory_space<vmem>>, vector<1x128x128xbf16>
    %6 = vector.shape_cast %5 : vector<1x128x128xbf16> to vector<128x128xbf16>
    %cst = arith.constant dense<0.000000e+00> : vector<64x128xf32>
    %7 = tpu.matmul %4, %6, %cst {dimension_numbers = #tpu.dot_dimension_numbers<[1], [0], [0], [1], [0, 0, 1, 1], [], []>} : vector<64x128xbf16>, vector<128x128xbf16>, vector<64x128xf32> -> vector<64x128xf32>
    %c0_5 = arith.constant 0 : index
    %c0_6 = arith.constant 0 : index
    %8 = vector.load %arg11[%c0_5, %c0_6] : memref<64x128xf32, #tpu.memory_space<vmem>>, vector<64x128xf32>
    %9 = arith.truncf %8 : vector<64x128xf32> to vector<64x128xbf16>
    %c0_7 = arith.constant 0 : index
    %c0_8 = arith.constant 0 : index
    %c0_9 = arith.constant 0 : index
    %10 = vector.load %arg6[%c0_7, %c0_8, %c0_9] : memref<1x128x128xbf16, #tpu.memory_space<vmem>>, vector<1x128x128xbf16>
    %11 = vector.shape_cast %10 : vector<1x128x128xbf16> to vector<128x128xbf16>
    %cst_10 = arith.constant dense<0.000000e+00> : vector<64x128xf32>
    %12 = tpu.matmul %9, %11, %cst_10 {dimension_numbers = #tpu.dot_dimension_numbers<[1], [0], [0], [1], [0, 0, 1, 1], [], []>} : vector<64x128xbf16>, vector<128x128xbf16>, vector<64x128xf32> -> vector<64x128xf32>
    %c0_11 = arith.constant 0 : index
    %c0_12 = arith.constant 0 : index
    %13 = vector.load %arg2[%c0_11, %c0_12] : memref<64x64xbf16, #tpu.memory_space<vmem>>, vector<64x64xbf16>
    %14 = arith.truncf %7 : vector<64x128xf32> to vector<64x128xbf16>
    %cst_13 = arith.constant dense<0.000000e+00> : vector<64x128xf32>
    %15 = tpu.matmul %13, %14, %cst_13 {dimension_numbers = #tpu.dot_dimension_numbers<[1], [0], [0], [1], [0, 0, 1, 1], [], []>} : vector<64x64xbf16>, vector<64x128xbf16>, vector<64x128xf32> -> vector<64x128xf32>
    %16 = arith.addf %15, %12 : vector<64x128xf32>
    %cst_14 = arith.constant 0.000000e+00 : f32
    %17 = vector.broadcast %cst_14 : f32 to vector<64x128xf32>
    %18 = arith.maximumf %16, %17 : vector<64x128xf32>
    %c0_15 = arith.constant 0 : index
    %c0_16 = arith.constant 0 : index
    %19 = vector.load %arg10[%c0_15, %c0_16] : memref<64x128xf32, #tpu.memory_space<vmem>>, vector<64x128xf32>
    tpu.vector_store %arg10[%c0_15, %c0_16], %18 {strides = array<i32>} : memref<64x128xf32, #tpu.memory_space<vmem>>, vector<64x128xf32>,
    %c1_i32 = arith.constant 1 : i32
    %20 = arith.cmpi eq, %arg0, %c1_i32 : i32
    %21 = arith.extui %20 : i1 to i32
    %c0_i32_17 = arith.constant 0 : i32
    %22 = arith.cmpi ne, %21, %c0_i32_17 : i32
    scf.if %22 {
      %c0_18 = arith.constant 0 : index
      %c0_19 = arith.constant 0 : index
      %23 = vector.load %arg10[%c0_18, %c0_19] : memref<64x128xf32, #tpu.memory_space<vmem>>, vector<64x128xf32>
      %24 = arith.truncf %23 : vector<64x128xf32> to vector<64x128xbf16>
      %c0_20 = arith.constant 0 : index
      %c0_21 = arith.constant 0 : index
      %25 = vector.load %arg7[%c0_20, %c0_21] : memref<128x128xbf16, #tpu.memory_space<vmem>>, vector<128x128xbf16>
      %cst_22 = arith.constant dense<0.000000e+00> : vector<64x128xf32>
      %26 = tpu.matmul %24, %25, %cst_22 {dimension_numbers = #tpu.dot_dimension_numbers<[1], [0], [0], [1], [0, 0, 1, 1], [], []>} : vector<64x128xbf16>, vector<128x128xbf16>, vector<64x128xf32> -> vector<64x128xf32>
      %c0_23 = arith.constant 0 : index
      %c0_24 = arith.constant 0 : index
      %27 = vector.load %arg8[%c0_23, %c0_24] : memref<1x128xf32, #tpu.memory_space<vmem>>, vector<1x128xf32>
      %28 = vector.broadcast %27 : vector<1x128xf32> to vector<64x128xf32>
      %29 = arith.addf %26, %28 : vector<64x128xf32>
      %c0_25 = arith.constant 0 : index
      %c0_26 = arith.constant 0 : index
      %30 = vector.load %arg9[%c0_25, %c0_26] : memref<64x128xf32, #tpu.memory_space<vmem>>, vector<64x128xf32>
      tpu.vector_store %arg9[%c0_25, %c0_26], %29 {strides = array<i32>} : memref<64x128xf32, #tpu.memory_space<vmem>>, vector<64x128xf32>,
    } else {
    }
    return
  }
  func.func @transform_0(%arg0: i32) -> (i32, i32) {
    %c0_i32 = arith.constant 0 : i32
    %c0_i32_0 = arith.constant 0 : i32
    %c0_i32_1 = arith.constant 0 : i32
    return %c0_i32, %c0_i32_0 : i32, i32
  }
  func.func @transform_1(%arg0: i32) -> (i32, i32) {
    %c0_i32 = arith.constant 0 : i32
    %c0_i32_0 = arith.constant 0 : i32
    %c0_i32_1 = arith.constant 0 : i32
    return %c0_i32, %c0_i32_0 : i32, i32
  }
  func.func @transform_2(%arg0: i32) -> (i32, i32) {
    %c0_i32 = arith.constant 0 : i32
    %c0_i32_0 = arith.constant 0 : i32
    %c0_i32_1 = arith.constant 0 : i32
    return %c0_i32, %c0_i32_0 : i32, i32
  }
  func.func @transform_3(%arg0: i32) -> (i32, i32) {
    %c0_i32 = arith.constant 0 : i32
    %c0_i32_0 = arith.constant 0 : i32
    %c0_i32_1 = arith.constant 0 : i32
    return %c0_i32, %c0_i32_0 : i32, i32
  }
  func.func @transform_4(%arg0: i32) -> (i32, i32, i32) {
    %c0_i32 = arith.constant 0 : i32
    %c0_i32_0 = arith.constant 0 : i32
    %c0_i32_1 = arith.constant 0 : i32
    return %arg0, %c0_i32, %c0_i32_0 : i32, i32, i32
  }
  func.func @transform_5(%arg0: i32) -> (i32, i32, i32) {
    %c0_i32 = arith.constant 0 : i32
    %c0_i32_0 = arith.constant 0 : i32
    %c0_i32_1 = arith.constant 0 : i32
    return %arg0, %c0_i32, %c0_i32_0 : i32, i32, i32
  }
  func.func @transform_6(%arg0: i32) -> (i32, i32) {
    %c0_i32 = arith.constant 0 : i32
    %c0_i32_0 = arith.constant 0 : i32
    %c0_i32_1 = arith.constant 0 : i32
    return %c0_i32, %c0_i32_0 : i32, i32
  }
  func.func @transform_7(%arg0: i32) -> (i32, i32) {
    %c0_i32 = arith.constant 0 : i32
    %c0_i32_0 = arith.constant 0 : i32
    %c0_i32_1 = arith.constant 0 : i32
    return %c0_i32, %c0_i32_0 : i32, i32
  }
  func.func @transform_8(%arg0: i32) -> (i32, i32) {
    %c0_i32 = arith.constant 0 : i32
    %c0_i32_0 = arith.constant 0 : i32
    %c0_i32_1 = arith.constant 0 : i32
    return %c0_i32, %c0_i32_0 : i32, i32
  }
}

</mosaic_0001>

<bundles_post_ra>
// kernel: tpu_custom_call.1
= control target key start
LH: loop header
LB: loop body
LE: loop exit
PB: predicated region body
PF: predicated region fallthrough
CT: control target
= control target key end

     0   :  { %s2265_s0 = inlined_call_operand.hbm [shape: bf16[64,128], index: 0, kind: input, shape index: {}]   ;;  %s2266_s1 = inlined_call_operand.hbm [shape: bf16[64,64], index: 1, kind: input, shape index: {}]   ;;  %s2267_s2 = inlined_call_operand.hbm [shape: bf16[128,128], index: 2, kind: input, shape index: {}]   ;;  %s2268_s3 = inlined_call_operand.vmem [shape: f32[1,128], index: 3, kind: input, shape index: {}]   ;;  %s2269_s4 = inlined_call_operand.hbm [shape: bf16[2,128,128], index: 4, kind: input, shape index: {}]   ;;  %s2270_s5 = inlined_call_operand.hbm [shape: bf16[2,128,128], index: 5, kind: input, shape index: {}]   ;;  %s2271_s6 = inlined_call_operand.hbm [shape: bf16[128,128], index: 6, kind: input, shape index: {}]   ;;  %s2272_s7 = inlined_call_operand.vmem [shape: f32[1,128], index: 7, kind: input, shape index: {}]   ;;  %s2273_s8 = inlined_call_operand.hbm [shape: f32[64,128], index: 8, kind: output, shape index: {}]  }
   0x1   :  { %2284 = sst [smem:[#allocation22_spill]] %s2266_s1 }
   0x2   :  { %13 = vsyncpa [#allocation5], 0 }
   0x3   :  { %14 = vsyncpa [#allocation8], 0 }
   0x4   :  { %15 = vsyncpa [#allocation11], 0 }
   0x5   :  { %17 = vsyncpa [#allocation11 + $0x1], 0 }
   0x6   :  { %18 = vsyncpa [#allocation14], 0 }
   0x7   :  { %19 = vsyncpa [#allocation6], 0  ;;  %s2003_s27 = smov 0   ;;  %s2005_s28 = smov 0  }
   0x8   :  { %s2007_s29 = smov 0   ;;  %s2009_s30 = smov 0  }
   0x9 LB: > { %s2022_s9 = sadd.s32 4294967295, %s1945_s30   ;;  %p129_p0 = scmp.ne.s32.totalorder %s1937_s28, %s1933_s27  ;;  %s1945_s30 = sphi %s2009_s30, %s2305_s30   ;;  %s1941_s29 = sphi %s2007_s29, %s2308_s29   ;;  %s1937_s28 = sphi %s2005_s28, %s2307_s28   ;;  %s1933_s27 = sphi %s2003_s27, %s2306_s27  }
   0xa   : > { %p2280_p1 = scmp.eq.s32.totalorder %s2022_s9, 0  ;;  %p1294_p2 = scmp.ge.s32.totalorder %s1945_s30, 1 }
   0xb   : > { %p229_p3 = scmp.lt.s32.totalorder %s1945_s30, 3  ;;  %s1947_s12 = smov [#allocation7]  }
   0xc   : > { %p2031_p5 = por %p2280_p1, %p129_p0  ;;  %s254_s13 = sshll.u32 %s1947_s12, 4  ;;  %s255_s13 = int_to_ptr.vmem [resolvable:$true] %s254_s13 }
   0xd   : > { %p2035_p6 = pnand %p1294_p2, %p229_p3  ;;  %s2048_s15 = sadd.s32 1, %s1945_s30  }
   0xe   : > { %s2285_s10 = scalar_select %p2031_p5, 1, 0 }
   0xf   : > { %s2286_s11 = scalar_select %p2035_p6, 1, 0 }
  0x10   : > { %p1599_p7 = pneg %p2035_p6  ;;  %2288 = sst [smem:[#allocation21_spill]] %s2048_s15 }
  0x11   : > { %s116_s16 = sadd.s32 1, %s1941_s29  ;;  %s113_s17 = ssub.s32 %s1945_s30, %s2048_s15 }
  0x12   : > { %p2043_p8 = pnand %p1599_p7, %p2280_p1  ;;  %s1722_s18 = scalar_lea.vmem %s255_s13, 512 }
  0x13   : > { %p1723_p10 = scmp.ne.s32.totalorder %s255_s13, %s1722_s18  ;;  %p1730_p13 = scmp.lt.s32.totalorder %s255_s13, %s255_s13 }
  0x14   : > { %p2281_p9 = pneg %p2043_p8  ;;  %p1731_p0 = scmp.lt.s32.totalorder %s1722_s18, %s1722_s18 }
  0x16   : > { %p1725_p11 = pnand %p1723_p10, %p2281_p9  ;;  %p1732_p2 = por %p1731_p0, %p1730_p13 }
  0x18   : > { %p1726_p12 = pneg %p1725_p11 }
  0x1a   : > { %p1733_p3 = pnand %p1732_p2, %p1726_p12 }
  0x1c   : > { %1736 = shalt.err (!%p1733_p3)
}
  0x1d   : > { %s2276_s19 = smov 64   ;;  %s2278_s20 = smov 4  }
  0x1e   : > { %s2289_s1 = sld [smem:[#allocation22_spill]]  ;;  %p114_p7 = scmp.eq.s32.totalorder %s113_s17, 0 }
  0x1f   : > { %p123_p10 = scmp.ne.s32.totalorder %s1941_s29, %s1937_s28  ;;  %p124_p11 = scmp.eq.s32.totalorder %s1945_s30, 0 }
  0x20   : > { %p1623_p12 = scmp.lt.s32.totalorder %s1945_s30, 2  ;;  %s300_s24 = sand.u32 1, %s1945_s30  }
  0x21   : > { %s2071_s23 = scalar_select %p114_p7, %s1941_s29, %s116_s16  }
  0x22   : > { %p125_p13 = por %p124_p11, %p123_p10  ;;  %s302_s25 = sand.u32 1, %s1941_s29  }
  0x23   : > { %s2075_s26 = sshll.u32 %s302_s25, 6  ;;  %s1365_s27 = sshll.u32 %s1945_s30, 10 }
  0x24   : > { %1605 = dma.hbm_to_vmem [thread:$0]  (!%p2043_p8), %s2289_s1, 512, %s255_s13, [#allocation8], %s2276_s19, %s2276_s19, %s2278_s20  }
  0x25   : > { %s2081_s15 = scalar_lea.hbm %s2269_s4, %s1365_s27  ;;  %s304_s13 = scalar_lea.vmem [#allocation10], %s2075_s26 }
  0x26   : > { %s311_s17 = sshll.u32 %s304_s13, 4  ;;  %p2084_p0 = pnand %p1623_p12, %p125_p13  ;;  %s2088_s17 = int_to_ptr.vmem [resolvable:$true] %s311_s17 }
  0x27   : > { %s2093_s22 = scalar_lea.hbm %s2270_s5, %s1365_s27  ;;  %s2095_s25 = scalar_lea.sflag [#allocation11], %s300_s24 }
  0x28   : > { %s1737_s12 = scalar_lea.hbm %s2081_s15, 1024  ;;  %p1739_p3 = pneg %p2084_p0 }
  0x29   : > { %p1738_p2 = scmp.ne.s32.totalorder %s2081_s15, %s1737_s12  ;;  %s1742_s19 = scalar_lea.hbm %s2269_s4, 2048 }
  0x2a   : > { %p1743_p11 = scmp.lt.s32.totalorder %s2081_s15, %s2269_s4  ;;  %p1744_p12 = scmp.lt.s32.totalorder %s1742_s19, %s1737_s12 }
  0x2b   : > { %p1740_p7 = pnand %p1739_p3, %p1738_p2 }
  0x2c   : > { %p1745_p13 = por %p1744_p12, %p1743_p11 }
  0x2d   : > { %p1741_p10 = pneg %p1740_p7 }
  0x2f   : > { %p1746_p4 = pnand %p1745_p13, %p1741_p10 }
  0x31   : > { %1749 = shalt.err (!%p1746_p4)
}
  0x32   : > { %s1750_s24 = scalar_lea.vmem %s2088_s17, 1024  ;;  %s1950_s27 = smov [#allocation10]  }
  0x33   : > { %p1751_p1 = scmp.ne.s32.totalorder %s2088_s17, %s1750_s24  ;;  %s1755_s21 = sshll.u32 %s1950_s27, 4  ;;  %s1756_s21 = int_to_ptr.vmem [resolvable:$false] %s1755_s21 }
  0x34   : > { %s1757_s30 = scalar_lea.vmem %s1756_s21, 2048  ;;  %p1758_p9 = scmp.lt.s32.totalorder %s2088_s17, %s1756_s21 }
  0x35   : > { %p1753_p2 = pnand %p1751_p1, %p1739_p3  ;;  %p1759_p5 = scmp.lt.s32.totalorder %s1757_s30, %s1750_s24 }
  0x37   : > { %p1754_p7 = pneg %p1753_p2  ;;  %p1760_p6 = por %p1759_p5, %p1758_p9 }
  0x39   : > { %p1761_p11 = pnand %p1760_p6, %p1754_p7 }
  0x3b   : > { %1764 = shalt.err (!%p1761_p11)
}
  0x3c   : > { %s2291_s1 = smov 4   ;;  %s2292_s19 = smov 64  }
  0x3d   : > { %1615 = dma.hbm_to_vmem [thread:$0]  (!%p2084_p0), %s2081_s15, 1024, %s2088_s17, %s2095_s25, %s2292_s19, %s2292_s19, %s2291_s1  }
  0x3e   : > { %s325_s20 = scalar_lea.vmem [#allocation12], %s2075_s26  ;;  %s1951_s18 = smov [#allocation4]  }
  0x3f   : > { %s332_s12 = sshll.u32 %s325_s20, 4  ;;  %s241_s13 = sshll.u32 %s1951_s18, 4  ;;  %s2126_s12 = int_to_ptr.vmem [resolvable:$true] %s332_s12  ;;  %s242_s13 = int_to_ptr.vmem [resolvable:$true] %s241_s13 }
  0x40   : > { %s1776_s24 = scalar_lea.vmem %s242_s13, 512  ;;  %p2293_p4 = pneg %p2043_p8 }
  0x41   : > { %p1777_p1 = scmp.ne.s32.totalorder %s242_s13, %s1776_s24  ;;  %p1784_p9 = scmp.lt.s32.totalorder %s242_s13, %s242_s13 }
  0x42   : > { %p1785_p10 = scmp.lt.s32.totalorder %s1776_s24, %s1776_s24 }
  0x43   : > { %p1779_p5 = pnand %p1777_p1, %p2293_p4 }
  0x44   : > { %p1786_p12 = por %p1785_p10, %p1784_p9 }
  0x45   : > { %p1780_p6 = pneg %p1779_p5 }
  0x47   : > { %p1787_p13 = pnand %p1786_p12, %p1780_p6 }
  0x49   : > { %1790 = shalt.err (!%p1787_p13)
}
  0x4a   : > { %1602 = dma.hbm_to_vmem [thread:$0]  (!%p2043_p8), %s2265_s0, 512, %s242_s13, [#allocation5], %s2292_s19, %s2292_s19, %s2291_s1  }
  0x4b   : > { %s1952_s17 = smov [#allocation9]   ;;  %s1953_s21 = smov [#allocation13]  }
  0x4c   : > { %s267_s27 = sshll.u32 %s1952_s17, 4  ;;  %s283_s30 = sshll.u32 %s1953_s21, 4  ;;  %s268_s27 = int_to_ptr.vmem [resolvable:$true] %s267_s27  ;;  %s284_s30 = int_to_ptr.vmem [resolvable:$true] %s283_s30 }
  0x4d   : > { %s1802_s20 = scalar_lea.vmem %s268_s27, 1024  ;;  %p2294_p7 = pmov %p2293_p4 }
  0x4e   : > { %p1803_p2 = scmp.ne.s32.totalorder %s268_s27, %s1802_s20  ;;  %p1810_p4 = scmp.lt.s32.totalorder %s268_s27, %s268_s27 }
  0x4f   : > { %p1811_p5 = scmp.lt.s32.totalorder %s1802_s20, %s1802_s20 }
  0x50   : > { %p1805_p11 = pnand %p1803_p2, %p2294_p7 }
  0x51   : > { %p1812_p6 = por %p1811_p5, %p1810_p4 }
  0x52   : > { %p1806_p1 = pneg %p1805_p11 }
  0x54   : > { %p1813_p9 = pnand %p1812_p6, %p1806_p1 }
  0x56   : > { %1816 = shalt.err (!%p1813_p9)
}
  0x57   : > { %1608 = dma.hbm_to_vmem [thread:$0]  (!%p2043_p8), %s2267_s2, 1024, %s268_s27, [#allocation8], %s2292_s19, %s2292_s19, %s2291_s1  }
  0x58   : > { %s1828_s24 = scalar_lea.vmem %s284_s30, 1024  ;;  %p2295_p12 = pmov %p2294_p7 }
  0x59   : > { %p1829_p10 = scmp.ne.s32.totalorder %s284_s30, %s1828_s24  ;;  %p1836_p7 = scmp.lt.s32.totalorder %s284_s30, %s284_s30 }
  0x5a   : > { %p1837_p11 = scmp.lt.s32.totalorder %s1828_s24, %s1828_s24 }
  0x5b   : > { %p1831_p13 = pnand %p1829_p10, %p2295_p12 }
  0x5c   : > { %p1838_p1 = por %p1837_p11, %p1836_p7 }
  0x5d   : > { %p1832_p2 = pneg %p1831_p13 }
  0x5f   : > { %p1839_p4 = pnand %p1838_p1, %p1832_p2 }
  0x61   : > { %1842 = shalt.err (!%p1839_p4)
}
  0x62   : > { %1611 = dma.hbm_to_vmem [thread:$0]  (!%p2043_p8), %s2271_s6, 1024, %s284_s30, [#allocation14], %s2292_s19, %s2292_s19, %s2291_s1  }
  0x63   : > { %s1843_s17 = scalar_lea.hbm %s2093_s22, 1024  ;;  %s1848_s14 = scalar_lea.hbm %s2270_s5, 2048 }
  0x64   : > { %p1844_p5 = scmp.ne.s32.totalorder %s2093_s22, %s1843_s17  ;;  %p1849_p10 = scmp.lt.s32.totalorder %s2093_s22, %s2270_s5 }
  0x65   : > { %p1850_p12 = scmp.lt.s32.totalorder %s1848_s14, %s1843_s17 }
  0x66   : > { %p1846_p6 = pnand %p1844_p5, %p1739_p3 }
  0x67   : > { %p1851_p13 = por %p1850_p12, %p1849_p10 }
  0x68   : > { %p1847_p9 = pneg %p1846_p6 }
  0x6a   : > { %p1852_p2 = pnand %p1851_p13, %p1847_p9 }
  0x6c   : > { %1855 = shalt.err (!%p1852_p2)
}
  0x6d   : > { %s1856_s30 = scalar_lea.vmem %s2126_s12, 1024  ;;  %s1954_s13 = smov [#allocation12]  }
  0x6e   : > { %p1857_p8 = scmp.ne.s32.totalorder %s2126_s12, %s1856_s30  ;;  %s1861_s24 = sshll.u32 %s1954_s13, 4  ;;  %s1862_s24 = int_to_ptr.vmem [resolvable:$false] %s1861_s24 }
  0x6f   : > { %s1863_s15 = scalar_lea.vmem %s1862_s24, 2048  ;;  %p1864_p1 = scmp.lt.s32.totalorder %s2126_s12, %s1862_s24 }
  0x70   : > { %p1859_p7 = pnand %p1857_p8, %p1739_p3  ;;  %p1865_p4 = scmp.lt.s32.totalorder %s1863_s15, %s1856_s30 }
  0x72   : > { %p1860_p11 = pneg %p1859_p7  ;;  %p1866_p5 = por %p1865_p4, %p1864_p1 }
  0x74   : > { %p1867_p6 = pnand %p1866_p5, %p1860_p11 }
  0x76   : > { %1870 = shalt.err (!%p1867_p6)
}
  0x77   : > { %1618 = dma.hbm_to_vmem [thread:$0]  (!%p2084_p0), %s2093_s22, 1024, %s2126_s12, %s2095_s25, %s2292_s19, %s2292_s19, %s2291_s1  }
  0x78   : > { %p2296_p3 = scmp.ne.s32.totalorder %s2286_s11, 0 }
  0x79   : > { %p2297_p9 = scmp.eq.s32.totalorder (!%p2296_p3), %s2022_s9, 0 }
  0x7a   : > { %344 = sbr.rel (%p2296_p3) target bundleno = 1095 (0x447), region = 52 }
  0x7f   : > { %1912 = dma.done.wait (%p2297_p9), [#allocation5], 512   ;;  %p2298_p10 = pmov %p2297_p9 }
  0x80   : > { %p2299_p12 = pmov %p2297_p9 }
  0x81   : > { %1914 = vsyncadd (%p2298_p10), [#allocation5], 4294966784 }
  0x82   : > { %1916 = dma.done.wait (%p2299_p12), [#allocation8], 1536   ;;  %p2300_p13 = pmov %p2297_p9 }
  0x83   : > { %s358_s16 = sand.u32 1, %s2022_s9   ;;  %s360_s22 = sand.u32 1, %s1937_s28  }
  0x84   : > { %1918 = vsyncadd (%p2300_p13), [#allocation8], 4294965760  ;;  %s1310_s25 = sshll.u32 %s360_s22, 6  ;;  %s359_s11 = scalar_lea.sflag [#allocation11], %s358_s16 }
  0x85   : > { %s2199_s1 = scalar_lea.vmem [#allocation10], %s1310_s25  ;;  %p2301_p0 = scmp.ne.s32.totalorder %s2285_s10, 0 }
  0x87   : > { %1920 = dma.done.wait (%p2301_p0), %s359_s11, 2048  }
  0x88   : > { %1922 = vsyncadd (%p2301_p0), %s359_s11, 4294965248  ;;  %s2205_s19 = scalar_lea.vmem [#allocation12], %s1310_s25  ;;  %p2302_p2 = pmov %p2297_p9 }
  0x8a   : > { %1924 = dma.done.wait (%p2302_p2), [#allocation14], 1024   ;;  %p2303_p8 = pmov %p2302_p2 }
  0x8b   : > { %p2304_p7 = scmp.ne.s32.totalorder %s2022_s9, 0 }
  0x8c   : > { %1926 = vsyncadd (%p2303_p8), [#allocation14], 4294966272 }
  0x8d   : > { %412 = sbr.rel (%p2304_p7) target bundleno = 384 (0x180), region = 80 }
  0x92   : > { %v1671_v0 = vld [vmem:[#allocation9 + $0x38] sm:$0xff]   ;;  %v1672_v1 = vld [vmem:[#allocation9 + $0x30] sm:$0xff]   ;;  %v1673_v2 = vld [vmem:[#allocation9 + $0x28] sm:$0xff]  }
  0x93   : > { %1423 = vmatprep.subr.bf16.mxu0 %v1671_v0  ;;  %1535 = vmatprep.subr.bf16.mxu1 %v1671_v0  ;;  %v1674_v3 = vld [vmem:[#allocation9 + $0x20] sm:$0xff]   ;;  %v1680_v5 = vld [vmem:[#allocation4 + $0x10] sm:$0xff]   ;;  %v1675_v6 = vld [vmem:[#allocation9 + $0x18] sm:$0xff]  }
  0x94   : > { %1424 = vmatpush3.bf16.msra.mxu0 %v1671_v0  ;;  %1543 = vmatpush3.bf16.msra.mxu1 %v1671_v0  ;;  %v1679_v4 = vld [vmem:[#allocation4] sm:$0xff]   ;;  %v1676_v7 = vld [vmem:[#allocation9 + $0x10] sm:$0xff]   ;;  %v1677_v8 = vld [vmem:[#allocation9 + $0x8] sm:$0xff]  }
  0x95   : > { %1425 = vmatprep.subr.bf16.mxu0 %v1672_v1  ;;  %1536 = vmatprep.subr.bf16.mxu1 %v1672_v1  ;;  %v1678_v9 = vld [vmem:[#allocation9] sm:$0xff]   ;;  %v1681_v10 = vld [vmem:[#allocation4 + $0x8] sm:$0xff]   ;;  %v1682_v11 = vld [vmem:[#allocation4 + $0x18] sm:$0xff]  }
  0x96   : > { %1439 = vmatprep.mubr.bf16.mxu0 %v1679_v4  ;;  %1443 = vmatprep.mubr.bf16.mxu1 %v1680_v5  ;;  %v1314_v12 = vld [vmem:[%s2268_s3] ss:$0 sm:$0xff] }
  0x98   : > { %1426 = vmatpush3.bf16.msra.mxu0 %v1672_v1  ;;  %1544 = vmatpush3.bf16.msra.mxu1 %v1672_v1 }
  0x99   : > { %1427 = vmatprep.subr.bf16.mxu0 %v1673_v2  ;;  %1537 = vmatprep.subr.bf16.mxu1 %v1673_v2 }
  0x9c   : > { %1428 = vmatpush3.bf16.msra.mxu0 %v1673_v2  ;;  %1545 = vmatpush3.bf16.msra.mxu1 %v1673_v2 }
  0x9d   : > { %1429 = vmatprep.subr.bf16.mxu0 %v1674_v3  ;;  %1538 = vmatprep.subr.bf16.mxu1 %v1674_v3 }
  0xa0   : > { %1430 = vmatpush3.bf16.msra.mxu0 %v1674_v3  ;;  %1546 = vmatpush3.bf16.msra.mxu1 %v1674_v3 }
  0xa1   : > { %1431 = vmatprep.subr.bf16.mxu0 %v1675_v6  ;;  %1539 = vmatprep.subr.bf16.mxu1 %v1675_v6 }
  0xa4   : > { %1432 = vmatpush3.bf16.msra.mxu0 %v1675_v6  ;;  %1547 = vmatpush3.bf16.msra.mxu1 %v1675_v6 }
  0xa5   : > { %1433 = vmatprep.subr.bf16.mxu0 %v1676_v7  ;;  %1540 = vmatprep.subr.bf16.mxu1 %v1676_v7 }
  0xa8   : > { %1434 = vmatpush3.bf16.msra.mxu0 %v1676_v7  ;;  %1548 = vmatpush3.bf16.msra.mxu1 %v1676_v7 }
  0xa9   : > { %1435 = vmatprep.subr.bf16.mxu0 %v1677_v8  ;;  %1541 = vmatprep.subr.bf16.mxu1 %v1677_v8 }
  0xac   : > { %1436 = vmatpush3.bf16.msra.mxu0 %v1677_v8  ;;  %1549 = vmatpush3.bf16.msra.mxu1 %v1677_v8 }
  0xad   : > { %1437 = vmatprep.subr.bf16.mxu0 %v1678_v9  ;;  %1542 = vmatprep.subr.bf16.mxu1 %v1678_v9 }
  0xb0   : > { %1438 = vmatpush3.bf16.msra.mxu0 %v1678_v9  ;;  %1550 = vmatpush3.bf16.msra.mxu1 %v1678_v9 }
  0xb3   : > { %1440 = vmatmul.mubr.bf16.vlgmr.msra.gmra.mxu0 %v1681_v10  ;;  %1444 = vmatmul.mubr.bf16.vlgmr.msra.gmra.mxu1 %v1682_v11 }
 0x173   : > { %v1441_v13 = vpop.f32.mrf.mxu0  ;;  %v1445_v14 = vpop.f32.mrf.mxu1 }
 0x174   : > { %v559_v15 = vadd.f32 %v1441_v13, %v1314_v12  ;;  %v575_v16 = vadd.f32 %v1445_v14, %v1314_v12 }
 0x175   : > { %v550_v17 = vpop.f32.mrf.mxu0  ;;  %v566_v18 = vpop.f32.mrf.mxu1 }
 0x176   : > { %v583_v19 = vmax.f32 %v559_v15, 0.0  ;;  %v587_v20 = vmax.f32 %v575_v16, 0.0  ;;  %v551_v21 = vadd.f32 %v1314_v12, %v550_v17  ;;  %v567_v22 = vadd.f32 %v1314_v12, %v566_v18 }
 0x177   : > { %v1442_v23 = vpop.f32.mrf.mxu0  ;;  %v1446_v24 = vpop.f32.mrf.mxu1 }
 0x178   : > { %591 = vst [vmem:[#allocation2 + $0x18] sm:$0xff] %v583_v19  ;;  %599 = vst [vmem:[#allocation3 + $0x10] sm:$0xff] %v583_v19  ;;  %v581_v25 = vmax.f32 %v551_v21, 0.0  ;;  %v585_v26 = vmax.f32 %v567_v22, 0.0  ;;  %v562_v27 = vadd.f32 %v1442_v23, %v1314_v12  ;;  %v578_v28 = vadd.f32 %v1446_v24, %v1314_v12 }
 0x179   : > { %595 = vst [vmem:[#allocation2 + $0x28] sm:$0xff] %v587_v20  ;;  %603 = vst [vmem:[#allocation3 + $0x30] sm:$0xff] %v587_v20  ;;  %v553_v29 = vpop.f32.mrf.mxu0  ;;  %v569_v30 = vpop.f32.mrf.mxu1 }
 0x17a   : > { %589 = vst [vmem:[#allocation2 + $0x30] sm:$0xff] %v581_v25  ;;  %597 = vst [vmem:[#allocation3] sm:$0xff] %v581_v25  ;;  %v584_v31 = vmax.f32 %v562_v27, 0.0  ;;  %v588_v32 = vmax.f32 %v578_v28, 0.0  ;;  %v554_v33 = vadd.f32 %v1314_v12, %v553_v29  ;;  %v570_v34 = vadd.f32 %v1314_v12, %v569_v30 }
 0x17b   : > { %593 = vst [vmem:[#allocation2 + $0x8] sm:$0xff] %v585_v26  ;;  %601 = vst [vmem:[#allocation3 + $0x28] sm:$0xff] %v585_v26 }
 0x17c   : > { %592 = vst [vmem:[#allocation2 + $0x10] sm:$0xff] %v584_v31  ;;  %600 = vst [vmem:[#allocation3 + $0x20] sm:$0xff] %v584_v31  ;;  %v582_v35 = vmax.f32 %v554_v33, 0.0  ;;  %v586_v36 = vmax.f32 %v570_v34, 0.0 }
 0x17d   : > { %596 = vst [vmem:[#allocation2 + $0x38] sm:$0xff] %v588_v32  ;;  %604 = vst [vmem:[#allocation3 + $0x38] sm:$0xff] %v588_v32 }
 0x17e   : > { %590 = vst [vmem:[#allocation2] sm:$0xff] %v582_v35  ;;  %598 = vst [vmem:[#allocation3 + $0x18] sm:$0xff] %v582_v35 }
 0x17f   : > { %594 = vst [vmem:[#allocation2 + $0x20] sm:$0xff] %v586_v36  ;;  %602 = vst [vmem:[#allocation3 + $0x8] sm:$0xff] %v586_v36 }
 0x180 PF: > { %v1683_v37 = vld [vmem:[%s2199_s1 + $0x38] sm:$0xff]   ;;  %v1684_v38 = vld [vmem:[%s2199_s1 + $0x30] sm:$0xff]   ;;  %v1685_v39 = vld [vmem:[%s2199_s1 + $0x28] sm:$0xff]   ;;  %vm919_vm0 = vcmask 523264   ;;  %p1351_p11 = scmp.ne.s32.totalorder %s2022_s9, 1 }
 0x181   : > { %1447 = vmatprep.subr.bf16.mxu0 %v1683_v37  ;;  %v1686_v40 = vld [vmem:[%s2199_s1 + $0x20] sm:$0xff]   ;;  %v605_v41 = vld [vmem:[#allocation2 + $0x30] sm:$0xff]  ;;  %v1687_v44 = vld [vmem:[%s2199_s1 + $0x18] sm:$0xff]  }
 0x182   : > { %1448 = vmatpush3.bf16.msra.mxu0 %v1683_v37  ;;  %v1691_v45 = vld [vmem:[%s2205_s19 + $0x38] sm:$0xff]   ;;  %v1692_v46 = vld [vmem:[%s2205_s19 + $0x30] sm:$0xff]   ;;  %v1693_v47 = vld [vmem:[%s2205_s19 + $0x28] sm:$0xff]  }
 0x183   : > { %1449 = vmatprep.subr.bf16.mxu0 %v1684_v38  ;;  %1471 = vmatprep.subr.bf16.mxu1 %v1691_v45  ;;  %v1688_v48 = vld [vmem:[%s2199_s1 + $0x10] sm:$0xff]   ;;  %v1694_v49 = vld [vmem:[%s2205_s19 + $0x20] sm:$0xff]   ;;  %v1689_v50 = vld [vmem:[%s2199_s1 + $0x8] sm:$0xff]  }
 0x184   : > { %1472 = vmatpush3.bf16.msra.mxu1 %v1691_v45  ;;  %v1695_v51 = vld [vmem:[%s2205_s19 + $0x18] sm:$0xff]   ;;  %v1690_v52 = vld [vmem:[%s2199_s1] sm:$0xff]   ;;  %v608_v54 = vld [vmem:[#allocation2 + $0x10] sm:$0xff] }
 0x185   : > { %v606_v42 = vld [vmem:[#allocation2] sm:$0xff]  ;;  %1473 = vmatprep.subr.bf16.mxu1 %v1692_v46  ;;  %v607_v53 = vld [vmem:[#allocation2 + $0x18] sm:$0xff]  ;;  %v1696_v55 = vld [vmem:[%s2205_s19 + $0x10] sm:$0xff]  }
 0x186   : > { %1450 = vmatpush3.bf16.msra.mxu0 %v1684_v38  ;;  %v613_v43 = vpack.c.bf16 %v606_v42, %v605_v41  ;;  %v609_v56 = vld [vmem:[#allocation2 + $0x8] sm:$0xff]  ;;  %v610_v57 = vld [vmem:[#allocation2 + $0x20] sm:$0xff]  ;;  %v614_v58 = vpack.c.bf16 %v608_v54, %v607_v53  ;;  %v612_v61 = vld [vmem:[#allocation2 + $0x38] sm:$0xff] }
 0x187   : > { %1451 = vmatprep.subr.bf16.mxu0 %v1685_v39  ;;  %v615_v59 = vpack.c.bf16 %v610_v57, %v609_v56  ;;  %v611_v60 = vld [vmem:[#allocation2 + $0x28] sm:$0xff]  ;;  %v1698_v0 = vld [vmem:[%s2205_s19] sm:$0xff]   ;;  %v747_v2 = vld [vmem:[#allocation3 + $0x18] sm:$0xff] }
 0x188   : > { %1463 = vmatprep.mubr.bf16.mxu0 %v613_v43  ;;  %1474 = vmatpush3.bf16.msra.mxu1 %v1692_v46  ;;  %v616_v62 = vpack.c.bf16 %v612_v61, %v611_v60  ;;  %v1697_v63 = vld [vmem:[%s2205_s19 + $0x8] sm:$0xff]   ;;  %v746_v1 = vld [vmem:[#allocation3] sm:$0xff]  ;;  %v748_v4 = vld [vmem:[#allocation3 + $0x10] sm:$0xff] }
 0x189   : > { %1475 = vmatprep.subr.bf16.mxu1 %v1693_v47  ;;  %v754_v3 = vpack.c.bf16 %v747_v2, %v746_v1  ;;  %v749_v5 = vld [vmem:[#allocation3 + $0x20] sm:$0xff]  ;;  %v750_v7 = vld [vmem:[#allocation3 + $0x28] sm:$0xff]  ;;  %v752_v10 = vld [vmem:[#allocation3 + $0x30] sm:$0xff] }
 0x18a   : > { %1452 = vmatpush3.bf16.msra.mxu0 %v1685_v39  ;;  %v755_v6 = vpack.c.bf16 %v749_v5, %v748_v4  ;;  %v751_v8 = vld [vmem:[#allocation3 + $0x8] sm:$0xff]  ;;  %v753_v11 = vld [vmem:[#allocation3 + $0x38] sm:$0xff]  ;;  %v1699_v13 = vld [vmem:[#allocation7] sm:$0xff]  }
 0x18b   : > { %1453 = vmatprep.subr.bf16.mxu0 %v1686_v40  ;;  %1487 = vmatprep.mubr.bf16.mxu1 %v754_v3  ;;  %v756_v9 = vpack.c.bf16 %v751_v8, %v750_v7  ;;  %v757_v12 = vpack.c.bf16 %v753_v11, %v752_v10  ;;  %v1700_v14 = vld [vmem:[#allocation7 + $0x10] sm:$0xff]   ;;  %v1701_v27 = vld [vmem:[#allocation7 + $0x8] sm:$0xff]   ;;  %v1702_v28 = vld [vmem:[#allocation7 + $0x18] sm:$0xff]  }
 0x18c   : > { %1476 = vmatpush3.bf16.msra.mxu1 %v1693_v47 }
 0x18d   : > { %1477 = vmatprep.subr.bf16.mxu1 %v1694_v49 }
 0x18e   : > { %1454 = vmatpush3.bf16.msra.mxu0 %v1686_v40 }
 0x18f   : > { %1455 = vmatprep.subr.bf16.mxu0 %v1687_v44 }
 0x190   : > { %1478 = vmatpush3.bf16.msra.mxu1 %v1694_v49 }
 0x191   : > { %1479 = vmatprep.subr.bf16.mxu1 %v1695_v51 }
 0x192   : > { %1456 = vmatpush3.bf16.msra.mxu0 %v1687_v44 }
 0x193   : > { %1457 = vmatprep.subr.bf16.mxu0 %v1688_v48 }
 0x194   : > { %1480 = vmatpush3.bf16.msra.mxu1 %v1695_v51 }
 0x195   : > { %1481 = vmatprep.subr.bf16.mxu1 %v1696_v55 }
 0x196   : > { %1458 = vmatpush3.bf16.msra.mxu0 %v1688_v48 }
 0x197   : > { %1459 = vmatprep.subr.bf16.mxu0 %v1689_v50 }
 0x198   : > { %1482 = vmatpush3.bf16.msra.mxu1 %v1696_v55 }
 0x199   : > { %1483 = vmatprep.subr.bf16.mxu1 %v1697_v63 }
 0x19a   : > { %1460 = vmatpush3.bf16.msra.mxu0 %v1689_v50 }
 0x19b   : > { %1461 = vmatprep.subr.bf16.mxu0 %v1690_v52 }
 0x19c   : > { %1484 = vmatpush3.bf16.msra.mxu1 %v1697_v63 }
 0x19d   : > { %1485 = vmatprep.subr.bf16.mxu1 %v1698_v0 }
 0x19e   : > { %1462 = vmatpush3.bf16.msra.mxu0 %v1690_v52 }
 0x1a0   : > { %1486 = vmatpush3.bf16.msra.mxu1 %v1698_v0 }
 0x1a1   : > { %1464 = vmatmul.mubr.bf16.vlgmr.msra.gmra.mxu0 %v614_v58 }
 0x1a2   : > { %1467 = vmatprep.mubr.bf16.mxu0 %v615_v59 }
 0x1a3   : > { %1488 = vmatmul.mubr.bf16.vlgmr.msra.gmra.mxu1 %v755_v6 }
 0x1a4   : > { %1491 = vmatprep.mubr.bf16.mxu1 %v756_v9 }
 0x1a9   : > { %1468 = vmatmul.mubr.bf16.gmra.mxu0 %v616_v62 }
 0x1aa   : > { %1503 = vmatprep.mubr.msk.bf16.mxu0 %vm919_vm0, %v1699_v13 }
 0x1ab   : > { %1492 = vmatmul.mubr.bf16.gmra.mxu1 %v757_v12 }
 0x1ac   : > { %1507 = vmatprep.mubr.msk.bf16.mxu1 %vm919_vm0, %v1700_v14 }
 0x261   : > { %v1465_v15 = vpop.f32.mrf.mxu0 }
 0x263   : > { %v715_v16 = vpop.f32.mrf.mxu0  ;;  %v1489_v29 = vpop.f32.mrf.mxu1 }
 0x265   : > { %v1466_v17 = vpop.f32.mrf.mxu0  ;;  %v856_v30 = vpop.f32.mrf.mxu1 }
 0x266   : > { %v896_v25 = vpack.c.bf16 %v1466_v17, %v1465_v15 }
 0x267   : > { %v718_v18 = vpop.f32.mrf.mxu0  ;;  %v1490_v31 = vpop.f32.mrf.mxu1 }
 0x268   : > { %v895_v26 = vpack.c.bf16 %v718_v18, %v715_v16 }
 0x269   : > { %v1469_v19 = vpop.f32.mrf.mxu0  ;;  %v859_v32 = vpop.f32.mrf.mxu1 }
 0x26b   : > { %v731_v20 = vpop.f32.mrf.mxu0  ;;  %v1493_v33 = vpop.f32.mrf.mxu1 }
 0x26d   : > { %v1470_v21 = vpop.f32.mrf.mxu0  ;;  %v872_v34 = vpop.f32.mrf.mxu1 }
 0x26e   : > { %v898_v22 = vpack.c.bf16 %v1470_v21, %v1469_v19 }
 0x26f   : > { %v734_v23 = vpop.f32.mrf.mxu0  ;;  %v1494_v35 = vpop.f32.mrf.mxu1 }
 0x270   : > { %v897_v24 = vpack.c.bf16 %v734_v23, %v731_v20  ;;  %1495 = vmatprep.subr.bf16.mxu0 %v898_v22  ;;  %1551 = vmatprep.subr.bf16.mxu1 %v898_v22 }
 0x271   : > { %1496 = vmatpush3.bf16.msra.mxu0 %v898_v22  ;;  %1555 = vmatpush3.bf16.msra.mxu1 %v898_v22  ;;  %v875_v36 = vpop.f32.mrf.mxu1 }
 0x272   : > { %1497 = vmatprep.subr.bf16.mxu0 %v897_v24  ;;  %1552 = vmatprep.subr.bf16.mxu1 %v897_v24 }
 0x275   : > { %1498 = vmatpush3.bf16.msra.mxu0 %v897_v24  ;;  %1556 = vmatpush3.bf16.msra.mxu1 %v897_v24 }
 0x276   : > { %1499 = vmatprep.subr.bf16.mxu0 %v896_v25  ;;  %1553 = vmatprep.subr.bf16.mxu1 %v896_v25 }
 0x279   : > { %1500 = vmatpush3.bf16.msra.mxu0 %v896_v25  ;;  %1557 = vmatpush3.bf16.msra.mxu1 %v896_v25 }
 0x27a   : > { %1501 = vmatprep.subr.bf16.mxu0 %v895_v26  ;;  %1554 = vmatprep.subr.bf16.mxu1 %v895_v26 }
 0x27d   : > { %1502 = vmatpush3.bf16.msra.mxu0 %v895_v26  ;;  %1558 = vmatpush3.bf16.msra.mxu1 %v895_v26 }
 0x280   : > { %1504 = vmatmul.mubr.msk.bf16.vlgmr.msra.gmra.mxu0 %vm919_vm0, %v1701_v27  ;;  %1508 = vmatmul.mubr.msk.bf16.vlgmr.msra.gmra.mxu1 %vm919_vm0, %v1702_v28 }
 0x340   : > { %v1505_v37 = vpop.f32.mrf.mxu0  ;;  %v1509_v38 = vpop.f32.mrf.mxu1 }
 0x341   : > { %v975_v39 = vadd.f32 %v1505_v37, %v1489_v29  ;;  %v991_v40 = vadd.f32 %v1509_v38, %v1493_v33 }
 0x342   : > { %v966_v41 = vpop.f32.mrf.mxu0  ;;  %v982_v42 = vpop.f32.mrf.mxu1 }
 0x343   : > { %v999_v43 = vmax.f32 %v975_v39, 0.0  ;;  %v1003_v44 = vmax.f32 %v991_v40, 0.0  ;;  %v967_v45 = vadd.f32 %v966_v41, %v856_v30  ;;  %v983_v46 = vadd.f32 %v982_v42, %v872_v34 }
 0x344   : > { %v1506_v47 = vpop.f32.mrf.mxu0  ;;  %v1510_v48 = vpop.f32.mrf.mxu1 }
 0x345   : > { %1007 = vst [vmem:[#allocation2 + $0x18] sm:$0xff] %v999_v43  ;;  %1011 = vst [vmem:[#allocation2 + $0x28] sm:$0xff] %v1003_v44  ;;  %v997_v49 = vmax.f32 %v967_v45, 0.0  ;;  %v1001_v50 = vmax.f32 %v983_v46, 0.0  ;;  %v978_v51 = vadd.f32 %v1506_v47, %v1490_v31  ;;  %v994_v52 = vadd.f32 %v1510_v48, %v1494_v35 }
 0x346   : > { %v969_v53 = vpop.f32.mrf.mxu0  ;;  %v985_v54 = vpop.f32.mrf.mxu1 }
 0x347   : > { %1005 = vst [vmem:[#allocation2 + $0x30] sm:$0xff] %v997_v49  ;;  %1009 = vst [vmem:[#allocation2 + $0x8] sm:$0xff] %v1001_v50  ;;  %v1000_v55 = vmax.f32 %v978_v51, 0.0  ;;  %v1004_v56 = vmax.f32 %v994_v52, 0.0  ;;  %v970_v57 = vadd.f32 %v969_v53, %v859_v32  ;;  %v986_v58 = vadd.f32 %v985_v54, %v875_v36  ;;  %1016 = sbr.rel (%p1351_p11) target bundleno = 1079 (0x437), region = 84 }
 0x349   : > { %1008 = vst [vmem:[#allocation2 + $0x10] sm:$0xff] %v1000_v55  ;;  %1012 = vst [vmem:[#allocation2 + $0x38] sm:$0xff] %v1004_v56  ;;  %v998_v59 = vmax.f32 %v970_v57, 0.0  ;;  %v1002_v60 = vmax.f32 %v986_v58, 0.0 }
 0x34b   : > { %1006 = vst [vmem:[#allocation2] sm:$0xff] %v998_v59  ;;  %1010 = vst [vmem:[#allocation2 + $0x20] sm:$0xff] %v1002_v60 }
 0x34c   : > { %v1703_v61 = vld [vmem:[#allocation13 + $0x38] sm:$0xff]   ;;  %v1704_v62 = vld [vmem:[#allocation13 + $0x30] sm:$0xff]   ;;  %v1705_v63 = vld [vmem:[#allocation13 + $0x28] sm:$0xff]  }
 0x34d   : > { %1511 = vmatprep.subr.bf16.mxu0 %v1703_v61  ;;  %1559 = vmatprep.subr.bf16.mxu1 %v1703_v61  ;;  %v1706_v0 = vld [vmem:[#allocation13 + $0x20] sm:$0xff]   ;;  %v1707_v7 = vld [vmem:[#allocation13 + $0x18] sm:$0xff]   ;;  %v1708_v8 = vld [vmem:[#allocation13 + $0x10] sm:$0xff]  }
 0x34e   : > { %1512 = vmatpush3.bf16.msra.mxu0 %v1703_v61  ;;  %1567 = vmatpush3.bf16.msra.mxu1 %v1703_v61  ;;  %v1017_v1 = vld [vmem:[#allocation2 + $0x30] sm:$0xff]  ;;  %v1021_v3 = vld [vmem:[#allocation2 + $0x8] sm:$0xff]  ;;  %v1710_v10 = vld [vmem:[#allocation13] sm:$0xff]  }
 0x34f   : > { %1513 = vmatprep.subr.bf16.mxu0 %v1704_v62  ;;  %1560 = vmatprep.subr.bf16.mxu1 %v1704_v62  ;;  %v1709_v9 = vld [vmem:[#allocation13 + $0x8] sm:$0xff]   ;;  %v1019_v11 = vld [vmem:[#allocation2 + $0x18] sm:$0xff]  ;;  %v1352_v17 = vld [vmem:[%s2272_s7] ss:$0 sm:$0xff] }
 0x350   : > { %v1020_v12 = vld [vmem:[#allocation2 + $0x10] sm:$0xff]  ;;  %v1023_v13 = vld [vmem:[#allocation2 + $0x28] sm:$0xff]  ;;  %v1024_v14 = vld [vmem:[#allocation2 + $0x38] sm:$0xff] }
 0x351   : > { %v1026_v15 = vpack.c.bf16 %v1020_v12, %v1019_v11  ;;  %v1028_v16 = vpack.c.bf16 %v1024_v14, %v1023_v13 }
 0x352   : > { %1514 = vmatpush3.bf16.msra.mxu0 %v1704_v62  ;;  %1568 = vmatpush3.bf16.msra.mxu1 %v1704_v62  ;;  %v1018_v2 = vld [vmem:[#allocation2] sm:$0xff] }
 0x353   : > { %1515 = vmatprep.subr.bf16.mxu0 %v1705_v63  ;;  %1561 = vmatprep.subr.bf16.mxu1 %v1705_v63  ;;  %v1025_v4 = vpack.c.bf16 %v1018_v2, %v1017_v1  ;;  %v1022_v5 = vld [vmem:[#allocation2 + $0x20] sm:$0xff] }
 0x354   : > { %v1027_v6 = vpack.c.bf16 %v1022_v5, %v1021_v3 }
 0x355   : > { %1527 = vmatprep.mubr.bf16.mxu0 %v1025_v4 }
 0x356   : > { %1516 = vmatpush3.bf16.msra.mxu0 %v1705_v63  ;;  %1569 = vmatpush3.bf16.msra.mxu1 %v1705_v63 }
 0x357   : > { %1517 = vmatprep.subr.bf16.mxu0 %v1706_v0  ;;  %1562 = vmatprep.subr.bf16.mxu1 %v1706_v0 }
 0x358   : > { %1531 = vmatprep.mubr.bf16.mxu1 %v1027_v6 }
 0x35a   : > { %1518 = vmatpush3.bf16.msra.mxu0 %v1706_v0  ;;  %1570 = vmatpush3.bf16.msra.mxu1 %v1706_v0 }
 0x35b   : > { %1519 = vmatprep.subr.bf16.mxu0 %v1707_v7  ;;  %1563 = vmatprep.subr.bf16.mxu1 %v1707_v7 }
 0x35e   : > { %1520 = vmatpush3.bf16.msra.mxu0 %v1707_v7  ;;  %1571 = vmatpush3.bf16.msra.mxu1 %v1707_v7 }
 0x35f   : > { %1521 = vmatprep.subr.bf16.mxu0 %v1708_v8  ;;  %1564 = vmatprep.subr.bf16.mxu1 %v1708_v8 }
 0x362   : > { %1522 = vmatpush3.bf16.msra.mxu0 %v1708_v8  ;;  %1572 = vmatpush3.bf16.msra.mxu1 %v1708_v8 }
 0x363   : > { %1523 = vmatprep.subr.bf16.mxu0 %v1709_v9  ;;  %1565 = vmatprep.subr.bf16.mxu1 %v1709_v9 }
 0x366   : > { %1524 = vmatpush3.bf16.msra.mxu0 %v1709_v9  ;;  %1573 = vmatpush3.bf16.msra.mxu1 %v1709_v9 }
 0x367   : > { %1525 = vmatprep.subr.bf16.mxu0 %v1710_v10  ;;  %1566 = vmatprep.subr.bf16.mxu1 %v1710_v10 }
 0x36a   : > { %1526 = vmatpush3.bf16.msra.mxu0 %v1710_v10  ;;  %1574 = vmatpush3.bf16.msra.mxu1 %v1710_v10 }
 0x36d   : > { %1528 = vmatmul.mubr.bf16.vlgmr.msra.gmra.mxu0 %v1026_v15  ;;  %1532 = vmatmul.mubr.bf16.vlgmr.msra.gmra.mxu1 %v1028_v16 }
 0x42d   : > { %v1529_v18 = vpop.f32.mrf.mxu0  ;;  %v1533_v19 = vpop.f32.mrf.mxu1 }
 0x42e   : > { %v1143_v20 = vadd.f32 %v1529_v18, %v1352_v17  ;;  %v1159_v21 = vadd.f32 %v1533_v19, %v1352_v17 }
 0x42f   : > { %v1134_v22 = vpop.f32.mrf.mxu0  ;;  %v1150_v23 = vpop.f32.mrf.mxu1 }
 0x430   : > { %1167 = vst [vmem:[#allocation15 + $0x10] sm:$0xff] %v1143_v20  ;;  %1171 = vst [vmem:[#allocation15 + $0x30] sm:$0xff] %v1159_v21  ;;  %v1135_v24 = vadd.f32 %v1352_v17, %v1134_v22  ;;  %v1151_v25 = vadd.f32 %v1352_v17, %v1150_v23 }
 0x431   : > { %v1530_v26 = vpop.f32.mrf.mxu0  ;;  %v1534_v27 = vpop.f32.mrf.mxu1 }
 0x432   : > { %1165 = vst [vmem:[#allocation15] sm:$0xff] %v1135_v24  ;;  %1169 = vst [vmem:[#allocation15 + $0x20] sm:$0xff] %v1151_v25  ;;  %v1146_v28 = vadd.f32 %v1530_v26, %v1352_v17  ;;  %v1162_v29 = vadd.f32 %v1534_v27, %v1352_v17 }
 0x433   : > { %v1137_v30 = vpop.f32.mrf.mxu0  ;;  %v1153_v31 = vpop.f32.mrf.mxu1 }
 0x434   : > { %1168 = vst [vmem:[#allocation15 + $0x18] sm:$0xff] %v1146_v28  ;;  %1172 = vst [vmem:[#allocation15 + $0x38] sm:$0xff] %v1162_v29  ;;  %v1138_v32 = vadd.f32 %v1352_v17, %v1137_v30  ;;  %v1154_v33 = vadd.f32 %v1352_v17, %v1153_v31 }
 0x436   : > { %1166 = vst [vmem:[#allocation15 + $0x8] sm:$0xff] %v1138_v32  ;;  %1170 = vst [vmem:[#allocation15 + $0x28] sm:$0xff] %v1154_v33 }
 0x437 PF: > { %p1628_p1 = scmp.eq.s32.totalorder %s2022_s9, 1  ;;  %s1955_s27 = smov [#allocation15]  }
 0x438   : > { %s1179_s21 = sshll.u32 %s1955_s27, 4  ;;  %s1180_s21 = int_to_ptr.vmem [resolvable:$true] %s1179_s21 }
 0x439   : > { %s1871_s14 = scalar_lea.vmem %s1180_s21, 1024  ;;  %p1878_p3 = scmp.lt.s32.totalorder %s1180_s21, %s1180_s21 }
 0x43a   : > { %p1872_p4 = scmp.ne.s32.totalorder %s1180_s21, %s1871_s14  ;;  %p1879_p9 = scmp.lt.s32.totalorder %s1871_s14, %s1871_s14 }
 0x43c   : > { %p1873_p5 = pnand %p1872_p4, %p1628_p1  ;;  %p1880_p10 = por %p1879_p9, %p1878_p3 }
 0x43e   : > { %p1874_p6 = pneg %p1873_p5 }
 0x440   : > { %p1881_p12 = pnand %p1880_p10, %p1874_p6 }
 0x442   : > { %1884 = shalt.err (!%p1881_p12)
}
 0x443   : > { %s1956_s20 = smov 128   ;;  %s1957_s18 = smov 8  }
 0x444   : > { %1596 = dma.vmem_to_hbm [thread:$0]  (%p1628_p1), %s1180_s21, 1024, %s2273_s8, [#allocation6], %s1956_s20, %s1956_s20, %s1957_s18  }
 0x445   : > { %1928 = dma.done.wait (%p1628_p1), [#allocation6], 1024  }
 0x446   : > { %1930 = vsyncadd (%p1628_p1), [#allocation6], 4294966272 }
 0x447 PF: > { %s2305_s30 = sld [smem:[#allocation21_spill]]  ;;  %s2306_s27 = smov %s1937_s28 }
 0x448   : > { %s2307_s28 = smov %s1941_s29  ;;  %s2308_s29 = smov %s2071_s23 }
 0x44d   : > { %p22_p13 = scmp.ge.s32.totalorder %s2305_s30, 4  }
 0x44f   :  { %24 = sbr.rel (!%p22_p13) target bundleno = 9 (0x9), region = 125 }
 0x454   :  { %1195 = vsyncpa [#allocation5], 1 }
 0x455   :  { %1197 = vsyncpa [#allocation5 + $0x1], 1 }
 0x456   :  { %1198 = vsyncpa [#allocation8], 1 }
 0x457   :  { %1199 = vsyncpa [#allocation11], 1 }
 0x458   :  { %1201 = vsyncpa [#allocation11 + $0x1], 1 }
 0x459   :  { %1202 = vsyncpa [#allocation14], 1 }
 0x45a   :  { %1203 = vsyncpa [#allocation6], 1 }
 0x45b   :  { %1205 = vsyncpa [#allocation6 + $0x1], 1 }

</bundles_post_ra>
